<compile_context>
chip_gen: v6e
topology: v6e:2x2x1
jax: 0.10.0
libtpu: 0.0.40
codegen_flags: <defaults>
</compile_context>

<pallas_src>
import functools

import jax
import jax.numpy as jnp
from jax import lax
from jax.experimental import pallas as pl
from jax.experimental.pallas import tpu as pltpu

_EPS = 1e-5
_VMEM_LIMIT_BYTES = 32 * 1024 * 1024      # safe on v5e/v6e/v7x; blocks here are tiny anyway
_BLOCK_BUDGET_BYTES = 2 << 20             # per-grid-step f32 working-set cap


def _pick_hw_tile(hw, c, elem_bytes=4, budget_bytes=_BLOCK_BUDGET_BYTES):
    """Largest multiple-of-128 divisor of hw whose (C, tile) f32 block fits the budget."""
    if hw % 128 != 0:
        return hw  # full-extent block along the last dim is always legal (may be masked)
    best = 128
    t = 128
    while t <= hw:
        if hw % t == 0 and c * t * elem_bytes <= budget_bytes:
            best = t
        t += 128
    return best


def _bn_stats_kernel(x_ref, mean_ref, rstd_ref, sum_sc, sumsq_sc, *, count, eps):
    """Accumulate per-channel sum / sum-of-squares; finalize mean & rstd on last step."""
    n = pl.program_id(0)
    s = pl.program_id(1)

    @pl.when((n == 0) & (s == 0))
    def _init():
        sum_sc[...] = jnp.zeros_like(sum_sc)
        sumsq_sc[...] = jnp.zeros_like(sumsq_sc)

    x = x_ref[...].astype(jnp.float32)                        # (1, C, TILE)
    # Single-pass accumulation in f32 (avoids a second sweep over the block).
    sum_sc[...] += jnp.sum(x, axis=2, keepdims=True)          # (1, C, 1)
    sumsq_sc[...] += jnp.sum(x * x, axis=2, keepdims=True)    # (1, C, 1)

    @pl.when((n == pl.num_programs(0) - 1) & (s == pl.num_programs(1) - 1))
    def _finalize():
        inv_count = 1.0 / count
        mean = sum_sc[...] * inv_count
        var = sumsq_sc[...] * inv_count - mean * mean         # biased var (train-mode BN)
        var = jnp.maximum(var, 0.0)                           # guard tiny negative rounding
        mean_ref[...] = mean
        rstd_ref[...] = lax.rsqrt(var + eps)                  # EUP rsqrt (free slot)


def _bn_affine_kernel(cid_ref, x_ref, mean_ref, rstd_ref, gamma_ref, beta_ref, o_ref):
    """out = gamma * (x - mean) * rstd + beta, folded to one scale/shift FMA."""
    del cid_ref  # only consumed by the data-dependent index maps
    x = x_ref[...].astype(jnp.float32)                        # (1, C, TILE)
    gamma = gamma_ref[...].astype(jnp.float32)                # (1, C, 1)
    beta = beta_ref[...].astype(jnp.float32)                  # (1, C, 1)
    scale = gamma * rstd_ref[...]
    shift = beta - scale * mean_ref[...]
    o_ref[...] = (x * scale + shift).astype(o_ref.dtype)


def conditional_norm(x, class_id, embed_weight, *, eps=_EPS):
    """x: (N, C, H, W); class_id: (N,) int; embed_weight: (num_classes, 2*C)."""
    N, C, H, W = x.shape
    HW = H * W
    x3 = x.reshape(N, C, HW)
    tile = _pick_hw_tile(HW, C)
    n_chunks = HW // tile

    # ---------------- pass 1: per-channel batch statistics ----------------
    mean, rstd = pl.pallas_call(
        functools.partial(_bn_stats_kernel, count=float(N * HW), eps=eps),
        out_shape=(jax.ShapeDtypeStruct((1, C, 1), jnp.float32),
                   jax.ShapeDtypeStruct((1, C, 1), jnp.float32)),
        grid_spec=pltpu.PrefetchScalarGridSpec(
            num_scalar_prefetch=0,
            grid=(N, n_chunks),
            in_specs=[pl.BlockSpec((1, C, tile), lambda n, s: (n, 0, s))],
            out_specs=(pl.BlockSpec((1, C, 1), lambda n, s: (0, 0, 0)),
                       pl.BlockSpec((1, C, 1), lambda n, s: (0, 0, 0))),
            scratch_shapes=[pltpu.VMEM((1, C, 1), jnp.float32),
                            pltpu.VMEM((1, C, 1), jnp.float32)]),
        compiler_params=pltpu.CompilerParams(
            # reduction spans the whole grid -> both axes sequential
            dimension_semantics=("arbitrary", "arbitrary"),
            vmem_limit_bytes=_VMEM_LIMIT_BYTES),
    )(x3)

    # Split the embedding table into per-class gamma/beta, shaped for (1, C, 1) blocks.
    num_classes = embed_weight.shape[0]
    gamma_tab = embed_weight[:, :C].reshape(num_classes, C, 1)
    beta_tab = embed_weight[:, C:].reshape(num_classes, C, 1)

    # ------------- pass 2: normalize + class-conditional affine -------------
    out3 = pl.pallas_call(
        _bn_affine_kernel,
        out_shape=jax.ShapeDtypeStruct((N, C, HW), x.dtype),
        grid_spec=pltpu.PrefetchScalarGridSpec(
            num_scalar_prefetch=1,  # class_id lands in SMEM, drives the embedding gather
            grid=(N, n_chunks),
            in_specs=[pl.BlockSpec((1, C, tile), lambda n, s, cid: (n, 0, s)),
                      pl.BlockSpec((1, C, 1), lambda n, s, cid: (0, 0, 0)),
                      pl.BlockSpec((1, C, 1), lambda n, s, cid: (0, 0, 0)),
                      pl.BlockSpec((1, C, 1), lambda n, s, cid: (cid[n], 0, 0)),
                      pl.BlockSpec((1, C, 1), lambda n, s, cid: (cid[n], 0, 0))],
            out_specs=pl.BlockSpec((1, C, tile), lambda n, s, cid: (n, 0, s))),
        compiler_params=pltpu.CompilerParams(
            # every (n, chunk) tile is independent -> megacore-shardable on v7x
            dimension_semantics=("parallel", "parallel"),
            vmem_limit_bytes=_VMEM_LIMIT_BYTES),
    )(class_id.astype(jnp.int32), x3, mean, rstd, gamma_tab, beta_tab)

    return out3.reshape(N, C, H, W)


if __name__ == "__main__":
    key = jax.random.PRNGKey(0)
    k_x, k_g, k_b = jax.random.split(key, 3)

    N, C, H, W = 2, 4, 16, 16
    num_classes = 5

    x = jax.random.normal(k_x, (N, C, H, W), dtype=jnp.float32)
    # Module init is gamma=1 / beta=0; add a small deterministic perturbation so the
    # conditional-affine path is actually exercised by the check.
    embed_weight = jnp.concatenate(
        [1.0 + 0.1 * jax.random.normal(k_g, (num_classes, C)),
         0.1 * jax.random.normal(k_b, (num_classes, C))],
        axis=1).astype(jnp.float32)
    class_id = jnp.array([1, 3], dtype=jnp.int32)

    out = conditional_norm(x, class_id, embed_weight)
    out = jax.block_until_ready(out)

    # Pure-JAX reference of the same forward math (train-mode BatchNorm2d + affine).
    x32 = x.astype(jnp.float32)
    mean = x32.mean(axis=(0, 2, 3), keepdims=True)
    var = x32.var(axis=(0, 2, 3), keepdims=True)        # biased var, as PyTorch normalizes with
    bn = (x32 - mean) / jnp.sqrt(var + _EPS)
    gamma = embed_weight[class_id, :C][:, :, None, None]
    beta = embed_weight[class_id, C:][:, :, None, None]
    ref = gamma * bn + beta

    assert jnp.allclose(out, ref, atol=1e-4, rtol=1e-4), "mismatch vs reference"
    print("KERNEL_OK")
</pallas_src>

<mosaic_0001>
module attributes {stable_mosaic.version = 11 : i64} {
  func.func @_bn_stats_kernel(%arg0: i32, %arg1: i32, %arg2: memref<1x4x256xf32, #tpu.memory_space<vmem>>, %arg3: memref<1x4x1xf32, #tpu.memory_space<vmem>>, %arg4: memref<1x4x1xf32, #tpu.memory_space<vmem>>, %arg5: memref<1x4x1xf32, #tpu.memory_space<vmem>>, %arg6: memref<1x4x1xf32, #tpu.memory_space<vmem>>) attributes {dimension_semantics = [#tpu.dimension_semantics<arbitrary>, #tpu.dimension_semantics<arbitrary>], iteration_bounds = array<i64: 2, 1>, scalar_prefetch = 0 : i64, scratch_operands = 2 : i64, tpu.core_type = #tpu.core_type<tc>, window_params = [{transform_indices = @transform_0, window_bounds = array<i64: 1, 4, 256>}, {pipeline_mode = #tpu.pipeline_mode<synchronous>, transform_indices = @transform_1, window_bounds = array<i64: 1, 4, 1>}, {pipeline_mode = #tpu.pipeline_mode<synchronous>, transform_indices = @transform_2, window_bounds = array<i64: 1, 4, 1>}]} {
    %c0_i32 = arith.constant 0 : i32
    %0 = arith.cmpi eq, %arg0, %c0_i32 : i32
    %c0_i32_0 = arith.constant 0 : i32
    %1 = arith.cmpi eq, %arg1, %c0_i32_0 : i32
    %2 = arith.andi %0, %1 : i1
    %3 = arith.extui %2 : i1 to i32
    %c0_i32_1 = arith.constant 0 : i32
    %4 = arith.cmpi ne, %3, %c0_i32_1 : i32
    scf.if %4 {
      %cst_19 = arith.constant 0.000000e+00 : f32
      %22 = vector.broadcast %cst_19 : f32 to vector<1x4x1xf32>
      %c0_20 = arith.constant 0 : index
      %c0_21 = arith.constant 0 : index
      %c0_22 = arith.constant 0 : index
      %23 = vector.load %arg5[%c0_20, %c0_21, %c0_22] : memref<1x4x1xf32, #tpu.memory_space<vmem>>, vector<1x4x1xf32>
      tpu.vector_store %arg5[%c0_20, %c0_21, %c0_22], %22 {strides = array<i32>} : memref<1x4x1xf32, #tpu.memory_space<vmem>>, vector<1x4x1xf32>,
      %cst_23 = arith.constant 0.000000e+00 : f32
      %24 = vector.broadcast %cst_23 : f32 to vector<1x4x1xf32>
      %c0_24 = arith.constant 0 : index
      %c0_25 = arith.constant 0 : index
      %c0_26 = arith.constant 0 : index
      %25 = vector.load %arg6[%c0_24, %c0_25, %c0_26] : memref<1x4x1xf32, #tpu.memory_space<vmem>>, vector<1x4x1xf32>
      tpu.vector_store %arg6[%c0_24, %c0_25, %c0_26], %24 {strides = array<i32>} : memref<1x4x1xf32, #tpu.memory_space<vmem>>, vector<1x4x1xf32>,
    } else {
    }
    %c0 = arith.constant 0 : index
    %c0_2 = arith.constant 0 : index
    %c0_3 = arith.constant 0 : index
    %5 = vector.load %arg2[%c0, %c0_2, %c0_3] : memref<1x4x256xf32, #tpu.memory_space<vmem>>, vector<1x4x256xf32>
    %c0_4 = arith.constant 0 : index
    %c0_5 = arith.constant 0 : index
    %c0_6 = arith.constant 0 : index
    %6 = vector.load %arg5[%c0_4, %c0_5, %c0_6] : memref<1x4x1xf32, #tpu.memory_space<vmem>>, vector<1x4x1xf32>
    %cst = arith.constant dense<0.000000e+00> : vector<1x4xf32>
    %7 = vector.multi_reduction <add>, %5, %cst [2] : vector<1x4x256xf32> to vector<1x4xf32>
    %8 = vector.shape_cast %7 : vector<1x4xf32> to vector<1x4x1xf32>
    %9 = arith.addf %6, %8 : vector<1x4x1xf32>
    %c0_7 = arith.constant 0 : index
    %c0_8 = arith.constant 0 : index
    %c0_9 = arith.constant 0 : index
    %10 = vector.load %arg5[%c0_7, %c0_8, %c0_9] : memref<1x4x1xf32, #tpu.memory_space<vmem>>, vector<1x4x1xf32>
    tpu.vector_store %arg5[%c0_7, %c0_8, %c0_9], %9 {strides = array<i32>} : memref<1x4x1xf32, #tpu.memory_space<vmem>>, vector<1x4x1xf32>,
    %c0_10 = arith.constant 0 : index
    %c0_11 = arith.constant 0 : index
    %c0_12 = arith.constant 0 : index
    %11 = vector.load %arg6[%c0_10, %c0_11, %c0_12] : memref<1x4x1xf32, #tpu.memory_space<vmem>>, vector<1x4x1xf32>
    %12 = arith.mulf %5, %5 : vector<1x4x256xf32>
    %cst_13 = arith.constant dense<0.000000e+00> : vector<1x4xf32>
    %13 = vector.multi_reduction <add>, %12, %cst_13 [2] : vector<1x4x256xf32> to vector<1x4xf32>
    %14 = vector.shape_cast %13 : vector<1x4xf32> to vector<1x4x1xf32>
    %15 = arith.addf %11, %14 : vector<1x4x1xf32>
    %c0_14 = arith.constant 0 : index
    %c0_15 = arith.constant 0 : index
    %c0_16 = arith.constant 0 : index
    %16 = vector.load %arg6[%c0_14, %c0_15, %c0_16] : memref<1x4x1xf32, #tpu.memory_space<vmem>>, vector<1x4x1xf32>
    tpu.vector_store %arg6[%c0_14, %c0_15, %c0_16], %15 {strides = array<i32>} : memref<1x4x1xf32, #tpu.memory_space<vmem>>, vector<1x4x1xf32>,
    %c1_i32 = arith.constant 1 : i32
    %17 = arith.cmpi eq, %arg0, %c1_i32 : i32
    %c0_i32_17 = arith.constant 0 : i32
    %18 = arith.cmpi eq, %arg1, %c0_i32_17 : i32
    %19 = arith.andi %17, %18 : i1
    %20 = arith.extui %19 : i1 to i32
    %c0_i32_18 = arith.constant 0 : i32
    %21 = arith.cmpi ne, %20, %c0_i32_18 : i32
    scf.if %21 {
      %c0_19 = arith.constant 0 : index
      %c0_20 = arith.constant 0 : index
      %c0_21 = arith.constant 0 : index
      %22 = vector.load %arg5[%c0_19, %c0_20, %c0_21] : memref<1x4x1xf32, #tpu.memory_space<vmem>>, vector<1x4x1xf32>
      %cst_22 = arith.constant 0.001953125 : f32
      %23 = vector.broadcast %cst_22 : f32 to vector<1x4x1xf32>
      %24 = arith.mulf %22, %23 : vector<1x4x1xf32>
      %c0_23 = arith.constant 0 : index
      %c0_24 = arith.constant 0 : index
      %c0_25 = arith.constant 0 : index
      %25 = vector.load %arg6[%c0_23, %c0_24, %c0_25] : memref<1x4x1xf32, #tpu.memory_space<vmem>>, vector<1x4x1xf32>
      %cst_26 = arith.constant 0.001953125 : f32
      %26 = vector.broadcast %cst_26 : f32 to vector<1x4x1xf32>
      %27 = arith.mulf %25, %26 : vector<1x4x1xf32>
      %28 = arith.mulf %24, %24 : vector<1x4x1xf32>
      %29 = arith.subf %27, %28 : vector<1x4x1xf32>
      %cst_27 = arith.constant 0.000000e+00 : f32
      %30 = vector.broadcast %cst_27 : f32 to vector<1x4x1xf32>
      %31 = arith.maximumf %29, %30 : vector<1x4x1xf32>
      %c0_28 = arith.constant 0 : index
      %c0_29 = arith.constant 0 : index
      %c0_30 = arith.constant 0 : index
      %32 = vector.load %arg3[%c0_28, %c0_29, %c0_30] : memref<1x4x1xf32, #tpu.memory_space<vmem>>, vector<1x4x1xf32>
      tpu.vector_store %arg3[%c0_28, %c0_29, %c0_30], %24 {strides = array<i32>} : memref<1x4x1xf32, #tpu.memory_space<vmem>>, vector<1x4x1xf32>,
      %cst_31 = arith.constant 9.99999974E-6 : f32
      %33 = vector.broadcast %cst_31 : f32 to vector<1x4x1xf32>
      %34 = arith.addf %31, %33 : vector<1x4x1xf32>
      %35 = math.rsqrt %34 : vector<1x4x1xf32>
      %c0_32 = arith.constant 0 : index
      %c0_33 = arith.constant 0 : index
      %c0_34 = arith.constant 0 : index
      %36 = vector.load %arg4[%c0_32, %c0_33, %c0_34] : memref<1x4x1xf32, #tpu.memory_space<vmem>>, vector<1x4x1xf32>
      tpu.vector_store %arg4[%c0_32, %c0_33, %c0_34], %35 {strides = array<i32>} : memref<1x4x1xf32, #tpu.memory_space<vmem>>, vector<1x4x1xf32>,
    } else {
    }
    return
  }
  func.func @transform_0(%arg0: i32, %arg1: i32) -> (i32, i32, i32) {
    %c0_i32 = arith.constant 0 : i32
    %c0_i32_0 = arith.constant 0 : i32
    return %arg0, %c0_i32, %arg1 : i32, i32, i32
  }
  func.func @transform_1(%arg0: i32, %arg1: i32) -> (i32, i32, i32) {
    %c0_i32 = arith.constant 0 : i32
    %c0_i32_0 = arith.constant 0 : i32
    %c0_i32_1 = arith.constant 0 : i32
    %c0_i32_2 = arith.constant 0 : i32
    return %c0_i32, %c0_i32_0, %c0_i32_1 : i32, i32, i32
  }
  func.func @transform_2(%arg0: i32, %arg1: i32) -> (i32, i32, i32) {
    %c0_i32 = arith.constant 0 : i32
    %c0_i32_0 = arith.constant 0 : i32
    %c0_i32_1 = arith.constant 0 : i32
    %c0_i32_2 = arith.constant 0 : i32
    return %c0_i32, %c0_i32_0, %c0_i32_1 : i32, i32, i32
  }
}

</mosaic_0001>

<bundles_post_ra>
// kernel: tpu_custom_call.1
= control target key start
LH: loop header
LB: loop body
LE: loop exit
PB: predicated region body
PF: predicated region fallthrough
CT: control target
= control target key end

     0   :  { %8 = vsyncpa [#allocation5], 0  ;;  %s548_s0 = inlined_call_operand.hbm [shape: f32[2,4,256], index: 0, kind: input, shape index: {}]   ;;  %s549_s1 = inlined_call_operand.vmem [shape: f32[1,4,1], index: 1, kind: output, shape index: {0}]   ;;  %s550_s2 = inlined_call_operand.vmem [shape: f32[1,4,1], index: 2, kind: output, shape index: {1}]  }
   0x1   :  { %10 = vsyncpa [#allocation5 + $0x1], 0  ;;  %s441_s9 = smov 0   ;;  %s443_s10 = smov 0  }
   0x2   :  { %s445_s11 = smov 0   ;;  %s447_s12 = smov 0  }
   0x3   :  { %s449_s13 = smov 0   ;;  %s451_s14 = smov 0  }
   0x4 LB: > { %s270_s15 = sadd.s32 4294967295, %s422_s14   ;;  %s28_s16 = sadd.s32 1, %s418_s13  ;;  %s422_s14 = sphi %s451_s14, %s16_s14   ;;  %s418_s13 = sphi %s449_s13, %s558_s13   ;;  %s414_s12 = sphi %s447_s12, %s557_s12   ;;  %s410_s11 = sphi %s445_s11, %s556_s11   ;;  %s406_s10 = sphi %s443_s10, %s555_s10   ;;  %s402_s9 = sphi %s441_s9, %s554_s9  }
   0x5   : > { %p30_p0 = scmp.ge.s32.totalorder %s28_s16, 2  ;;  %s37_s17 = sadd.s32 1, %s410_s11 }
   0x6   : > { %p44_p1 = scmp.ne.s32.totalorder %s410_s11, %s406_s10  ;;  %p45_p2 = scmp.eq.s32.totalorder %s422_s14, 0 }
   0x7   : > { %s560_s16 = smov (%p30_p0, %s28_s16), 0  ;;  %p50_p4 = scmp.ne.s32.totalorder %s406_s10, %s402_s9 }
   0x8   : > { %p477_p3 = por %p45_p2, %p44_p1  ;;  %s32_s19 = ssub.s32 %s418_s13, %s560_s16 }
   0x9   : > { %p51_p5 = scmp.eq.s32.totalorder %s270_s15, 0  ;;  %p35_p6 = scmp.eq.s32.totalorder %s32_s19, 0 }
   0xa   : > { %p291_p8 = scmp.lt.s32.totalorder %s422_s14, 2  ;;  %s116_s22 = sand.u32 1, %s410_s11  }
   0xb   : > { %p484_p7 = por %p51_p5, %p50_p4  ;;  %s282_s23 = sshll.u32 %s418_s13, 7 }
   0xc   : > { %s490_s21 = scalar_select %p35_p6, %s410_s11, %s37_s17  }
   0xd   : > { %s273_s24 = sshll.u32 %s116_s22, 3  ;;  %s128_s27 = scalar_lea.hbm %s548_s0, %s282_s23 }
   0xe   : > { %s120_s28 = scalar_lea.vmem [#allocation4], %s273_s24  ;;  %p499_p9 = pnand %p291_p8, %p477_p3 }
   0xf   : > { %s130_s29 = sshll.u32 %s120_s28, 4  ;;  %p276_p10 = scmp.ge.s32.totalorder %s422_s14, 1  ;;  %s131_s29 = int_to_ptr.vmem [resolvable:$true] %s130_s29 }
  0x10   : > { %p135_p11 = scmp.lt.s32.totalorder %s422_s14, 3  ;;  %s117_s3 = scalar_lea.sflag [#allocation5], %s116_s22 }
  0x11   : > { %p346_p12 = pneg %p499_p9  ;;  %s357_s4 = scalar_lea.vmem %s131_s29, 128 }
  0x12   : > { %p358_p13 = scmp.ne.s32.totalorder %s131_s29, %s357_s4  ;;  %s424_s5 = smov [#allocation4]  }
  0x13   : > { %s362_s6 = sshll.u32 %s424_s5, 4  ;;  %s363_s6 = int_to_ptr.vmem [resolvable:$false] %s362_s6 }
  0x14   : > { %p360_p0 = pnand %p358_p13, %p346_p12  ;;  %s364_s7 = scalar_lea.vmem %s363_s6, 256 }
  0x15   : > { %p365_p2 = scmp.lt.s32.totalorder %s131_s29, %s363_s6  ;;  %p366_p3 = scmp.lt.s32.totalorder %s364_s7, %s357_s4 }
  0x16   : > { %p361_p1 = pneg %p360_p0 }
  0x17   : > { %p367_p4 = por %p366_p3, %p365_p2 }
  0x19   : > { %p368_p5 = pnand %p367_p4, %p361_p1 }
  0x1b   : > { %371 = shalt.err (!%p368_p5)
}
  0x1c   : > { %290 = dma.hbm_to_vmem [thread:$0]  (!%p499_p9), %s128_s27, 128, %s131_s29, %s117_s3  }
  0x1d   : > { %p136_p6 = pnand %p276_p10, %p135_p11 }
  0x1e   : > { %s141_s8 = sand.u32 (!%p136_p6), 1, %s406_s10  }
  0x1f   : > { %139 = sbr.rel (%p136_p6) target bundleno = 225 (0xe1), region = 24  ;;  %s277_s9 = sshll.u32 (!%p136_p6), %s141_s8, 3 }
  0x20   : > { %s142_s15 = scalar_lea.sflag (!%p136_p6), [#allocation5], %s141_s8  ;;  %s145_s17 = scalar_lea.vmem (!%p136_p6), [#allocation4], %s277_s9 }
  0x24   : > { %397 = dma.done.wait (%p484_p7), %s142_s15, 128  }
  0x25   : > { %399 = vsyncadd (%p484_p7), %s142_s15, 4294967168  ;;  %p162_p8 = scmp.eq.s32.totalorder %s414_s12, 0 }
  0x26   : > { %vm168_vm0 = vcmask (%p162_p8), 3072   ;;  %v425_v0 = vmov (%p162_p8), 0.0  }
  0x27   : > { %167 = sbr.rel (!%p162_p8) target bundleno = 44 (0x2c), region = 32  ;;  %169 = vst.msk [vmem:[#allocation2] sm:$0xf] (%p162_p8), %vm168_vm0, %v425_v0  ;;  %170 = vst.msk [vmem:[#allocation3] sm:$0xf] (%p162_p8), %vm168_vm0, %v425_v0 }
  0x2c PF: > { %v171_v1 = vld [vmem:[%s145_s17] sm:$0xff]  ;;  %vm176_vm1 = vcmask 1043456   ;;  %p197_p7 = scmp.eq.s32.totalorder %s414_s12, 1  ;;  %vm183_vm2 = vcmask 3072  }
  0x2d   : > { %v174_v2 = vcombine.high %v171_v1, %v171_v1  ;;  %v177_v3 = vsel %vm176_vm1, %v171_v1, 0.0  ;;  %v186_v4 = vmul.f32 %v171_v1, %v171_v1 }
  0x2e   : > { %v172_v11 = vld [vmem:[#allocation2] sm:$0xf]  ;;  %v185_v14 = vld [vmem:[#allocation3] sm:$0xf] }
  0x2f   : > { %v178_v5 = vsel %vm176_vm1, %v174_v2, 0.0  ;;  %v188_v6 = vcombine.high %v186_v4, %v186_v4  ;;  %v190_v7 = vsel %vm176_vm1, %v186_v4, 0.0 }
  0x30   : > { %v179_v8 = vadd.f32 %v178_v5, %v177_v3 }
  0x31   : > { %v191_v9 = vsel %vm176_vm1, %v188_v6, 0.0 }
  0x32   : > { %180 = vadd.xlane.f32.xlu0 %v179_v8  ;;  %v192_v10 = vadd.f32 %v191_v9, %v190_v7 }
  0x36   : > { %193 = vadd.xlane.f32.xlu0 %v192_v10 }
  0xbb   : > { %v181_v12 = vpop.xlane.xlu0 %180 }
  0xbc   : > { %v182_v13 = vadd.f32 %v181_v12, %v172_v11 }
  0xbe   : > { %184 = vst.msk [vmem:[#allocation2] sm:$0xf] %vm183_vm2, %v182_v13  ;;  %201 = sbr.rel (!%p197_p7) target bundleno = 225 (0xe1), region = 36 }
  0xbf   : > { %v194_v15 = vpop.xlane.xlu0 %193 }
  0xc0   : > { %v195_v16 = vadd.f32 %v194_v15, %v185_v14 }
  0xc2   : > { %196 = vst.msk [vmem:[#allocation3] sm:$0xf] %vm183_vm2, %v195_v16 }
  0xc5   : > { %v202_v17 = vld [vmem:[#allocation2] sm:$0xf] }
  0xc6   : > { %v203_v19 = vmul.f32 0.001953125, %v202_v17 }
  0xc8   : > { %v206_v21 = vmul.f32 %v203_v19, %v203_v19  ;;  %209 = vst.msk [vmem:[%s549_s1] sm:$0xf] %vm183_vm2, %v203_v19 }
  0xc9   : > { %v204_v18 = vld [vmem:[#allocation3] sm:$0xf] }
  0xca   : > { %v205_v20 = vmul.f32 0.001953125, %v204_v18 }
  0xcc   : > { %v207_v22 = vsub.f32 %v205_v20, %v206_v21 }
  0xce   : > { %v208_v23 = vmax.f32 %v207_v22, 0.0 }
  0xd0   : > { %v210_v24 = vadd.f32 1e-05, %v208_v23 }
  0xd2   : > { %342 = vrsqrt.f32 %v210_v24 }
  0xdf   : > { %v343_v25 = vpop.eup %342 }
  0xe0   : > { %212 = vst.msk [vmem:[%s550_s2] sm:$0xf] %vm183_vm2, %v343_v25 }
  0xe1 PF: > { %s16_s14 = sadd.s32 1, %s422_s14   ;;  %s554_s9 = smov %s406_s10 }
  0xe2   : > { %p13_p9 = scmp.ge.s32.totalorder %s16_s14, 4   ;;  %s555_s10 = smov %s410_s11 }
  0xe3   : > { %s556_s11 = smov %s490_s21  ;;  %s557_s12 = smov %s418_s13 }
  0xe4   : > { %s558_s13 = smov %s560_s16  ;;  %15 = sbr.rel (!%p13_p9) target bundleno = 4 (0x4), region = 76 }
  0xe9   :  { %230 = vsyncpa [#allocation5], 1 }
  0xea   :  { %232 = vsyncpa [#allocation5 + $0x1], 1 }

</bundles_post_ra>
